<compile_context>
chip_gen: v7x
topology: tpu7x:2x2x1
jax: 0.10.0
libtpu: 0.0.40
codegen_flags: <defaults>
</compile_context>

<pallas_src>
import numpy as np
import jax
import jax.numpy as jnp
from jax.experimental import pallas as pl
from jax.experimental.pallas import tpu as pltpu

HIDDEN = 64      # logical hidden width of the module
HPAD = 128       # hidden width padded to one full vreg lane group / MXU tile


def actor_kernel(obs_ref, w1_ref, b1_ref, w2_ref, b2_ref, w3_ref, b3_ref, mu_ref):
    x = obs_ref[...]                                   # [TB, num_obs] f32
    wdt = w1_ref.dtype                                 # f32 or bf16 (MXU inputs only)

    # Bias-add and tanh stay in f32 (v5e has no bf16 VPU/EUP datapath).
    h1 = jnp.tanh(
        jnp.dot(x.astype(wdt), w1_ref[...], preferred_element_type=jnp.float32)
        + b1_ref[...]
    )                                                  # [TB, HPAD] f32
    h2 = jnp.tanh(
        jnp.dot(h1.astype(wdt), w2_ref[...], preferred_element_type=jnp.float32)
        + b2_ref[...]
    )                                                  # [TB, HPAD] f32
    mu = (
        jnp.dot(h2.astype(wdt), w3_ref[...], preferred_element_type=jnp.float32)
        + b3_ref[...]
    )                                                  # [TB, num_actions]
    mu_ref[...] = mu.astype(mu_ref.dtype)


def prepare_actor_params(params, *, weights_dtype=jnp.float32):
    """Hoisted (one-time) param prep: pad the hidden dim 64->128 with zeros and
    optionally cast weights to bf16 for the MXU.  Exact because padded biases are
    zero and tanh(0)=0, so padded hidden units contribute nothing downstream."""
    w1, b1, w2, b2, w3, b3, log_sigma = params
    num_obs = w1.shape[0]
    num_actions = w3.shape[1]

    w1p = jnp.zeros((num_obs, HPAD), jnp.float32).at[:, :HIDDEN].set(w1)
    b1p = jnp.zeros((1, HPAD), jnp.float32).at[:, :HIDDEN].set(b1)
    w2p = jnp.zeros((HPAD, HPAD), jnp.float32).at[:HIDDEN, :HIDDEN].set(w2)
    b2p = jnp.zeros((1, HPAD), jnp.float32).at[:, :HIDDEN].set(b2)
    w3p = jnp.zeros((HPAD, num_actions), jnp.float32).at[:HIDDEN, :].set(w3)

    if weights_dtype != jnp.float32:
        w1p = w1p.astype(weights_dtype)
        w2p = w2p.astype(weights_dtype)
        w3p = w3p.astype(weights_dtype)

    # Biases stay f32 (added after the f32 accumulation).
    return (w1p, b1p, w2p, b2p, w3p, b3, log_sigma)


def _choose_batch_tile(B, tile_b):
    """Largest tile that (a) fits tile_b and (b) yields >=2 grid steps for large B
    so dimension_semantics=('parallel',) actually uses both TensorCores on v7x."""
    if B <= 256:
        return B
    half = ((B + 1) // 2 + 7) // 8 * 8           # ~B/2 rounded up to a multiple of 8
    return min(tile_b, half)


def actor_forward(obs, prepped_params, *, tile_b=8192):
    """obs: [B, num_obs] float32.  prepped_params from prepare_actor_params.
    Returns (mu, sigma), both [B, num_actions] float32."""
    w1, b1, w2, b2, w3, b3, log_sigma = prepped_params
    B, num_obs = obs.shape
    num_actions = w3.shape[1]

    tb = _choose_batch_tile(B, tile_b)
    grid = (pl.cdiv(B, tb),)

    const2d = lambda i: (0, 0)   # weights/biases: same block every step (VMEM-resident)

    wbytes = (w1.size * w1.dtype.itemsize + w2.size * w2.dtype.itemsize
              + w3.size * w3.dtype.itemsize + (b1.size + b2.size + b3.size) * 4)
    cost = pl.CostEstimate(
        flops=2 * B * (num_obs * HPAD + HPAD * HPAD + HPAD * num_actions),
        transcendentals=2 * B * HPAD,                 # two tanh layers (padded width)
        bytes_accessed=B * num_obs * obs.dtype.itemsize
        + B * num_actions * 4
        + wbytes,
    )

    mu = pl.pallas_call(
        actor_kernel,
        out_shape=jax.ShapeDtypeStruct((B, num_actions), jnp.float32),
        grid=grid,
        in_specs=[
            pl.BlockSpec((tb, num_obs), lambda i: (i, 0)),        # obs tile (pipelined)
            pl.BlockSpec((num_obs, HPAD), const2d),               # w1 (padded)
            pl.BlockSpec((1, HPAD), const2d),                     # b1 (padded)
            pl.BlockSpec((HPAD, HPAD), const2d),                  # w2 (padded)
            pl.BlockSpec((1, HPAD), const2d),                     # b2 (padded)
            pl.BlockSpec((HPAD, num_actions), const2d),           # w3 (padded rows)
            pl.BlockSpec((1, num_actions), const2d),              # b3
        ],
        out_specs=pl.BlockSpec((tb, num_actions), lambda i: (i, 0)),  # unpadded mu
        compiler_params=pltpu.CompilerParams(
            dimension_semantics=("parallel",),                    # megacore on v7x
        ),
        cost_estimate=cost,
    )(obs, w1, b1, w2, b2, w3, b3)

    # sigma is batch-independent -> compute outside the kernel (no HBM writeback per row).
    sigma = jnp.broadcast_to(jnp.exp(log_sigma), mu.shape)
    return mu, sigma


def init_actor_params(key, num_obs, num_actions):
    """Deterministic init mirroring layer_init: orthogonal weights (given gain),
    zero biases, zero log_sigma.  Weights stored as [in, out]."""
    k1, k2, k3 = jax.random.split(key, 3)
    ortho = jax.nn.initializers.orthogonal

    w1 = ortho(scale=np.sqrt(2))(k1, (num_obs, HIDDEN), jnp.float32)
    b1 = jnp.zeros((1, HIDDEN), jnp.float32)
    w2 = ortho(scale=np.sqrt(2))(k2, (HIDDEN, HIDDEN), jnp.float32)
    b2 = jnp.zeros((1, HIDDEN), jnp.float32)
    w3 = ortho(scale=0.01)(k3, (HIDDEN, num_actions), jnp.float32)
    b3 = jnp.zeros((1, num_actions), jnp.float32)
    log_sigma = jnp.zeros((1, num_actions), jnp.float32)
    return (w1, b1, w2, b2, w3, b3, log_sigma)


def reference_forward(obs, params):
    w1, b1, w2, b2, w3, b3, log_sigma = params
    h = jnp.tanh(obs @ w1 + b1)
    h = jnp.tanh(h @ w2 + b2)
    mu = h @ w3 + b3
    sigma = jnp.broadcast_to(jnp.exp(log_sigma), mu.shape)
    return mu, sigma


if __name__ == "__main__":
    num_obs = 32
    num_actions = 8
    batch = 8

    key = jax.random.PRNGKey(0)
    k_params, k_obs = jax.random.split(key)
    params = init_actor_params(k_params, num_obs, num_actions)
    obs = jax.random.normal(k_obs, (batch, num_obs), dtype=jnp.float32)

    mu_ref, sigma_ref = reference_forward(obs, params)

    # --- f32 path (exact; strict tolerance) ---
    prepped_f32 = prepare_actor_params(params, weights_dtype=jnp.float32)
    mu, sigma = jax.jit(actor_forward)(obs, prepped_f32)
    jax.block_until_ready((mu, sigma))
    np.testing.assert_allclose(np.asarray(mu), np.asarray(mu_ref), rtol=1e-5, atol=1e-5)
    np.testing.assert_allclose(np.asarray(sigma), np.asarray(sigma_ref), rtol=1e-5, atol=1e-5)

    # --- bf16-weights path (recommended default on v6e/v7x; relaxed tolerance) ---
    prepped_bf16 = prepare_actor_params(params, weights_dtype=jnp.bfloat16)
    mu_b, sigma_b = jax.jit(actor_forward)(obs, prepped_bf16)
    jax.block_until_ready((mu_b, sigma_b))
    np.testing.assert_allclose(np.asarray(mu_b), np.asarray(mu_ref), rtol=2e-2, atol=2e-2)
    np.testing.assert_allclose(np.asarray(sigma_b), np.asarray(sigma_ref), rtol=2e-2, atol=2e-2)

    # TODO(synk): torch.distributions.Normal object itself is not representable
    # in a kernel; (mu, sigma) fully parameterize it.
    print("KERNEL_OK")
</pallas_src>

<mosaic_0001>
module attributes {stable_mosaic.version = 11 : i64} {
  func.func @actor_kernel(%arg0: i32, %arg1: memref<8x32xf32, #tpu.memory_space<vmem>>, %arg2: memref<32x128xf32, #tpu.memory_space<vmem>>, %arg3: memref<1x128xf32, #tpu.memory_space<vmem>>, %arg4: memref<128x128xf32, #tpu.memory_space<vmem>>, %arg5: memref<1x128xf32, #tpu.memory_space<vmem>>, %arg6: memref<128x8xf32, #tpu.memory_space<vmem>>, %arg7: memref<1x8xf32, #tpu.memory_space<vmem>>, %arg8: memref<8x8xf32, #tpu.memory_space<vmem>>) attributes {dimension_semantics = [#tpu.dimension_semantics<parallel>], iteration_bounds = array<i64: 1>, scalar_prefetch = 0 : i64, scratch_operands = 0 : i64, tpu.core_type = #tpu.core_type<tc>, window_params = [{transform_indices = @transform_0, window_bounds = array<i64: 8, 32>}, {pipeline_mode = #tpu.pipeline_mode<synchronous>, transform_indices = @transform_1, window_bounds = array<i64: 32, 128>}, {pipeline_mode = #tpu.pipeline_mode<synchronous>, transform_indices = @transform_2, window_bounds = array<i64: 1, 128>}, {pipeline_mode = #tpu.pipeline_mode<synchronous>, transform_indices = @transform_3, window_bounds = array<i64: 128, 128>}, {pipeline_mode = #tpu.pipeline_mode<synchronous>, transform_indices = @transform_4, window_bounds = array<i64: 1, 128>}, {pipeline_mode = #tpu.pipeline_mode<synchronous>, transform_indices = @transform_5, window_bounds = array<i64: 128, 8>}, {pipeline_mode = #tpu.pipeline_mode<synchronous>, transform_indices = @transform_6, window_bounds = array<i64: 1, 8>}, {transform_indices = @transform_7, window_bounds = array<i64: 8, 8>}]} {
    %c0 = arith.constant 0 : index
    %c0_0 = arith.constant 0 : index
    %0 = vector.load %arg1[%c0, %c0_0] : memref<8x32xf32, #tpu.memory_space<vmem>>, vector<8x32xf32>
    %c0_1 = arith.constant 0 : index
    %c0_2 = arith.constant 0 : index
    %1 = vector.load %arg2[%c0_1, %c0_2] : memref<32x128xf32, #tpu.memory_space<vmem>>, vector<32x128xf32>
    %cst = arith.constant dense<0.000000e+00> : vector<8x128xf32>
    %2 = tpu.matmul %0, %1, %cst {dimension_numbers = #tpu.dot_dimension_numbers<[1], [0], [0], [1], [0, 0, 1, 1], [], []>} : vector<8x32xf32>, vector<32x128xf32>, vector<8x128xf32> -> vector<8x128xf32>
    %c0_3 = arith.constant 0 : index
    %c0_4 = arith.constant 0 : index
    %3 = vector.load %arg3[%c0_3, %c0_4] : memref<1x128xf32, #tpu.memory_space<vmem>>, vector<1x128xf32>
    %4 = vector.broadcast %3 : vector<1x128xf32> to vector<8x128xf32>
    %5 = arith.addf %2, %4 : vector<8x128xf32>
    %6 = math.tanh %5 : vector<8x128xf32>
    %c0_5 = arith.constant 0 : index
    %c0_6 = arith.constant 0 : index
    %7 = vector.load %arg4[%c0_5, %c0_6] : memref<128x128xf32, #tpu.memory_space<vmem>>, vector<128x128xf32>
    %cst_7 = arith.constant dense<0.000000e+00> : vector<8x128xf32>
    %8 = tpu.matmul %6, %7, %cst_7 {dimension_numbers = #tpu.dot_dimension_numbers<[1], [0], [0], [1], [0, 0, 1, 1], [], []>} : vector<8x128xf32>, vector<128x128xf32>, vector<8x128xf32> -> vector<8x128xf32>
    %c0_8 = arith.constant 0 : index
    %c0_9 = arith.constant 0 : index
    %9 = vector.load %arg5[%c0_8, %c0_9] : memref<1x128xf32, #tpu.memory_space<vmem>>, vector<1x128xf32>
    %10 = vector.broadcast %9 : vector<1x128xf32> to vector<8x128xf32>
    %11 = arith.addf %8, %10 : vector<8x128xf32>
    %12 = math.tanh %11 : vector<8x128xf32>
    %c0_10 = arith.constant 0 : index
    %c0_11 = arith.constant 0 : index
    %13 = vector.load %arg6[%c0_10, %c0_11] : memref<128x8xf32, #tpu.memory_space<vmem>>, vector<128x8xf32>
    %cst_12 = arith.constant dense<0.000000e+00> : vector<8x8xf32>
    %14 = tpu.matmul %12, %13, %cst_12 {dimension_numbers = #tpu.dot_dimension_numbers<[1], [0], [0], [1], [0, 0, 1, 1], [], []>} : vector<8x128xf32>, vector<128x8xf32>, vector<8x8xf32> -> vector<8x8xf32>
    %c0_13 = arith.constant 0 : index
    %c0_14 = arith.constant 0 : index
    %15 = vector.load %arg7[%c0_13, %c0_14] : memref<1x8xf32, #tpu.memory_space<vmem>>, vector<1x8xf32>
    %16 = vector.broadcast %15 : vector<1x8xf32> to vector<8x8xf32>
    %17 = arith.addf %14, %16 : vector<8x8xf32>
    %c0_15 = arith.constant 0 : index
    %c0_16 = arith.constant 0 : index
    %18 = vector.load %arg8[%c0_15, %c0_16] : memref<8x8xf32, #tpu.memory_space<vmem>>, vector<8x8xf32>
    tpu.vector_store %arg8[%c0_15, %c0_16], %17 {strides = array<i32>} : memref<8x8xf32, #tpu.memory_space<vmem>>, vector<8x8xf32>,
    return
  }
  func.func @transform_0(%arg0: i32) -> (i32, i32) {
    %c0_i32 = arith.constant 0 : i32
    %c0_i32_0 = arith.constant 0 : i32
    return %arg0, %c0_i32 : i32, i32
  }
  func.func @transform_1(%arg0: i32) -> (i32, i32) {
    %c0_i32 = arith.constant 0 : i32
    %c0_i32_0 = arith.constant 0 : i32
    %c0_i32_1 = arith.constant 0 : i32
    return %c0_i32, %c0_i32_0 : i32, i32
  }
  func.func @transform_2(%arg0: i32) -> (i32, i32) {
    %c0_i32 = arith.constant 0 : i32
    %c0_i32_0 = arith.constant 0 : i32
    %c0_i32_1 = arith.constant 0 : i32
    return %c0_i32, %c0_i32_0 : i32, i32
  }
  func.func @transform_3(%arg0: i32) -> (i32, i32) {
    %c0_i32 = arith.constant 0 : i32
    %c0_i32_0 = arith.constant 0 : i32
    %c0_i32_1 = arith.constant 0 : i32
    return %c0_i32, %c0_i32_0 : i32, i32
  }
  func.func @transform_4(%arg0: i32) -> (i32, i32) {
    %c0_i32 = arith.constant 0 : i32
    %c0_i32_0 = arith.constant 0 : i32
    %c0_i32_1 = arith.constant 0 : i32
    return %c0_i32, %c0_i32_0 : i32, i32
  }
  func.func @transform_5(%arg0: i32) -> (i32, i32) {
    %c0_i32 = arith.constant 0 : i32
    %c0_i32_0 = arith.constant 0 : i32
    %c0_i32_1 = arith.constant 0 : i32
    return %c0_i32, %c0_i32_0 : i32, i32
  }
  func.func @transform_6(%arg0: i32) -> (i32, i32) {
    %c0_i32 = arith.constant 0 : i32
    %c0_i32_0 = arith.constant 0 : i32
    %c0_i32_1 = arith.constant 0 : i32
    return %c0_i32, %c0_i32_0 : i32, i32
  }
  func.func @transform_7(%arg0: i32) -> (i32, i32) {
    %c0_i32 = arith.constant 0 : i32
    %c0_i32_0 = arith.constant 0 : i32
    return %arg0, %c0_i32 : i32, i32
  }
}

</mosaic_0001>

<bundles_post_ra>
// kernel: actor_forward.1
= control target key start
LH: loop header
LB: loop body
LE: loop exit
PB: predicated region body
PF: predicated region fallthrough
CT: control target
= control target key end

     0   :  { %12 = vsyncpa [#allocation3], 0  ;;  %s769_s0 = inlined_call_operand.vmem [shape: f32[8,32], index: 0, kind: input, shape index: {}]   ;;  %s770_s1 = inlined_call_operand.hbm [shape: f32[32,128], index: 1, kind: input, shape index: {}]   ;;  %s771_s2 = inlined_call_operand.vmem [shape: f32[1,128], index: 2, kind: input, shape index: {}]   ;;  %s772_s3 = inlined_call_operand.vmem [shape: f32[128,128], index: 3, kind: input, shape index: {}]   ;;  %s773_s4 = inlined_call_operand.vmem [shape: f32[1,128], index: 4, kind: input, shape index: {}]   ;;  %s774_s5 = inlined_call_operand.vmem [shape: f32[128,8], index: 5, kind: input, shape index: {}]   ;;  %s775_s6 = inlined_call_operand.vmem [shape: f32[1,8], index: 6, kind: input, shape index: {}]   ;;  %s776_s7 = inlined_call_operand.hbm [shape: f32[8,8], index: 7, kind: output, shape index: {}]  }
   0x1   :  { %13 = vsyncpa [#allocation4], 0  ;;  %s569_s24 = smov [#allocation2]   ;;  %s521_s28 = scalar_lea.hbm %s770_s1, 512 }
   0x2   :  { %s21_s25 = sshll.u32 %s569_s24, 4  ;;  %p522_p0 = scmp.ne.s32.totalorder %s770_s1, %s521_s28  ;;  %s22_s25 = int_to_ptr.vmem [resolvable:$true] %s21_s25 }
   0x3   :  { %p525_p1 = scmp.lt.u32.totalorder %s521_s28, %s770_s1 }
   0x5   :  { %p527_p2 = pnand %p525_p1, %p522_p0 }
   0x7   :  { %530 = shalt.err (!%p527_p2)
}
   0x8   :  { %s531_s10 = scalar_lea.vmem %s22_s25, 512  ;;  %p536_p4 = scmp.lt.s32.totalorder %s22_s25, %s22_s25 }
   0x9   :  { %p532_p3 = scmp.ne.s32.totalorder %s22_s25, %s531_s10  ;;  %p537_p5 = scmp.lt.s32.totalorder %s531_s10, %s531_s10 }
   0xb   :  { %p538_p6 = por %p537_p5, %p536_p4 }
   0xd   :  { %p539_p7 = pnand %p538_p6, %p532_p3 }
   0xf   :  { %542 = shalt.err (!%p539_p7)
}
  0x10   :  { %s570_s11 = smov 128   ;;  %s571_s12 = smov 8  }
  0x11   :  { %27 = dma.hbm_to_vmem [thread:$0]  %s770_s1, 512, %s22_s25, [#allocation3], %s570_s11, %s570_s11, %s571_s12  }
  0x12   :  { %565 = dma.done.wait [#allocation3], 512  }
  0x13   :  { %566 = vsyncadd [#allocation3], 4294966784  ;;  %v572_v0 = vmov 0.0|0.0   ;;  %vm573_vm0 = vmmov 0   ;;  %v574_v1 = vmov 0.0   ;;  %v42_v2 = vld [vmem:[#allocation2] sm:$0xff] }
  0x14   :  { %456 = vmatprep.subr.bf16.mxu0 %v572_v0  ;;  %383 = vmatprep.mubr.msk.f32.mxu0 %vm573_vm0, %v574_v1  ;;  %v43_v3 = vld [vmem:[#allocation2 + $0x8] sm:$0xff]  ;;  %v44_v4 = vld [vmem:[#allocation2 + $0x10] sm:$0xff]  ;;  %v45_v6 = vld [vmem:[#allocation2 + $0x18] sm:$0xff]  ;;  %vm53_vm1 = vcmask 261120   ;;  %vm315_vm2 = vcmask 64512  }
  0x15   :  { %462 = vmatprep.subr.bf16.mxu1 %v572_v0  ;;  %418 = vmatprep.mubr.msk.f32.mxu1 %vm573_vm0, %v574_v1  ;;  %v457_v5 = vpack.c.bf16 %v43_v3, %v42_v2  ;;  %v128_v7 = vld [vmem:[%s772_s3] sm:$0xff]  ;;  %v129_v8 = vld [vmem:[%s772_s3 + $0x8] sm:$0xff]  ;;  %v130_v9 = vld [vmem:[%s772_s3 + $0x10] sm:$0xff]  ;;  %v460_v11 = vpack.c.bf16 %v45_v6, %v44_v4 }
  0x16   :  { %v131_v10 = vld [vmem:[%s772_s3 + $0x18] sm:$0xff]  ;;  %v463_v12 = vpack.c.bf16 %v129_v8, %v128_v7  ;;  %v132_v14 = vld [vmem:[%s772_s3 + $0x20] sm:$0xff]  ;;  %v133_v15 = vld [vmem:[%s772_s3 + $0x28] sm:$0xff] }
  0x17   :  { %458 = vmatpush3.bf16.msra.mxu0 %v457_v5  ;;  %v466_v13 = vpack.c.bf16 %v131_v10, %v130_v9  ;;  %v41_v16 = vld [vmem:[%s769_s0] sm:$0xff]  ;;  %v469_v17 = vpack.c.bf16 %v133_v15, %v132_v14  ;;  %v134_v18 = vld [vmem:[%s772_s3 + $0x30] sm:$0xff]  ;;  %v135_v19 = vld [vmem:[%s772_s3 + $0x38] sm:$0xff] }
  0x18   :  { %459 = vmatprep.subr.bf16.mxu0 %v572_v0  ;;  %464 = vmatpush3.bf16.msra.mxu1 %v463_v12  ;;  %v472_v20 = vpack.c.bf16 %v135_v19, %v134_v18  ;;  %v136_v21 = vld [vmem:[%s772_s3 + $0x40] sm:$0xff]  ;;  %v137_v22 = vld [vmem:[%s772_s3 + $0x48] sm:$0xff]  ;;  %v138_v24 = vld [vmem:[%s772_s3 + $0x50] sm:$0xff] }
  0x19   :  { %465 = vmatprep.subr.bf16.mxu1 %v572_v0  ;;  %v475_v23 = vpack.c.bf16 %v137_v22, %v136_v21  ;;  %v139_v25 = vld [vmem:[%s772_s3 + $0x58] sm:$0xff]  ;;  %v140_v27 = vld [vmem:[%s772_s3 + $0x60] sm:$0xff]  ;;  %v141_v28 = vld [vmem:[%s772_s3 + $0x68] sm:$0xff] }
  0x1a   :  { %v478_v26 = vpack.c.bf16 %v139_v25, %v138_v24  ;;  %v481_v29 = vpack.c.bf16 %v141_v28, %v140_v27  ;;  %v142_v30 = vld [vmem:[%s772_s3 + $0x70] sm:$0xff]  ;;  %v143_v31 = vld [vmem:[%s772_s3 + $0x78] sm:$0xff]  ;;  %v222_v33 = vld [vmem:[%s774_s5] sm:$0xff] }
  0x1b   :  { %461 = vmatpush3.bf16.msra.mxu0 %v460_v11  ;;  %v484_v32 = vpack.c.bf16 %v143_v31, %v142_v30  ;;  %v223_v34 = vld [vmem:[%s774_s5 + $0x8] sm:$0xff]  ;;  %v224_v35 = vld [vmem:[%s774_s5 + $0x10] sm:$0xff]  ;;  %v225_v37 = vld [vmem:[%s774_s5 + $0x18] sm:$0xff] }
  0x1c   :  { %486 = vmatprep.subr.bf16.mxu0 %v572_v0  ;;  %467 = vmatpush3.bf16.msra.mxu1 %v466_v13  ;;  %v487_v36 = vpack.c.bf16 %v223_v34, %v222_v33  ;;  %v490_v38 = vpack.c.bf16 %v225_v37, %v224_v35  ;;  %v226_v39 = vld [vmem:[%s774_s5 + $0x20] sm:$0xff]  ;;  %v227_v40 = vld [vmem:[%s774_s5 + $0x28] sm:$0xff]  ;;  %v228_v42 = vld [vmem:[%s774_s5 + $0x30] sm:$0xff] }
  0x1d   :  { %468 = vmatprep.subr.bf16.mxu1 %v572_v0  ;;  %v493_v41 = vpack.c.bf16 %v227_v40, %v226_v39  ;;  %v229_v43 = vld [vmem:[%s774_s5 + $0x38] sm:$0xff]  ;;  %v230_v45 = vld [vmem:[%s774_s5 + $0x40] sm:$0xff]  ;;  %v231_v46 = vld [vmem:[%s774_s5 + $0x48] sm:$0xff] }
  0x1e   :  { %384 = vmatmul.mubr.msk.f32.vlgmr.msra.gmra.mrb[0].mxu0 %vm53_vm1, %v41_v16  ;;  %v496_v44 = vpack.c.bf16 %v229_v43, %v228_v42  ;;  %v499_v47 = vpack.c.bf16 %v231_v46, %v230_v45  ;;  %v332_v48 = vld [vmem:[%s771_s2] ss:$0 sm:$0xff]  ;;  %v232_v53 = vld [vmem:[%s774_s5 + $0x50] sm:$0xff]  ;;  %v233_v54 = vld [vmem:[%s774_s5 + $0x58] sm:$0xff] }
  0x1f   :  { %453 = vmatprep.mubr.msk.f32.mxu0 %vm573_vm0, %v574_v1  ;;  %488 = vmatpush3.bf16.msra.mxu0 %v487_v36  ;;  %v502_v55 = vpack.c.bf16 %v233_v54, %v232_v53  ;;  %v234_v56 = vld [vmem:[%s774_s5 + $0x60] sm:$0xff]  ;;  %v235_v57 = vld [vmem:[%s774_s5 + $0x68] sm:$0xff]  ;;  %v236_v59 = vld [vmem:[%s774_s5 + $0x70] sm:$0xff] }
  0x20   :  { %470 = vmatpush3.bf16.msra.mxu1 %v469_v17  ;;  %489 = vmatprep.subr.bf16.mxu0 %v572_v0  ;;  %v505_v58 = vpack.c.bf16 %v235_v57, %v234_v56  ;;  %v237_v60 = vld [vmem:[%s774_s5 + $0x78] sm:$0xff]  ;;  %v334_v62 = vld [vmem:[%s773_s4] ss:$0 sm:$0xff]  ;;  %s575_s5 = smov [#allocation5]  }
  0x21   :  { %471 = vmatprep.subr.bf16.mxu1 %v572_v0  ;;  %v508_v61 = vpack.c.bf16 %v237_v60, %v236_v59  ;;  %v335_v4 = vld [vmem:[%s775_s6] ss:$0 sm:$0xff]  ;;  %s323_s9 = sshll.u32 %s575_s5, 4  ;;  %s324_s9 = int_to_ptr.vmem [resolvable:$true] %s323_s9 }
  0x22   :  { %s543_s10 = scalar_lea.vmem %s324_s9, 128  ;;  %p548_p9 = scmp.lt.s32.totalorder %s324_s9, %s324_s9 }
  0x23   :  { %491 = vmatpush3.bf16.msra.mxu0 %v490_v38  ;;  %p544_p8 = scmp.ne.s32.totalorder %s324_s9, %s543_s10  ;;  %p549_p10 = scmp.lt.s32.totalorder %s543_s10, %s543_s10 }
  0x24   :  { %473 = vmatpush3.bf16.msra.mxu1 %v472_v20  ;;  %492 = vmatprep.subr.bf16.mxu0 %v572_v0 }
  0x25   :  { %474 = vmatprep.subr.bf16.mxu1 %v572_v0  ;;  %p550_p11 = por %p549_p10, %p548_p9 }
  0x27   :  { %494 = vmatpush3.bf16.msra.mxu0 %v493_v41  ;;  %p551_p12 = pnand %p550_p11, %p544_p8 }
  0x28   :  { %476 = vmatpush3.bf16.msra.mxu1 %v475_v23  ;;  %495 = vmatprep.subr.bf16.mxu0 %v572_v0 }
  0x29   :  { %477 = vmatprep.subr.bf16.mxu1 %v572_v0 }
  0x2b   :  { %497 = vmatpush3.bf16.msra.mxu0 %v496_v44 }
  0x2c   :  { %479 = vmatpush3.bf16.msra.mxu1 %v478_v26  ;;  %498 = vmatprep.subr.bf16.mxu0 %v572_v0 }
  0x2d   :  { %480 = vmatprep.subr.bf16.mxu1 %v572_v0 }
  0x2f   :  { %500 = vmatpush3.bf16.msra.mxu0 %v499_v47 }
  0x30   :  { %482 = vmatpush3.bf16.msra.mxu1 %v481_v29  ;;  %501 = vmatprep.subr.bf16.mxu0 %v572_v0 }
  0x31   :  { %483 = vmatprep.subr.bf16.mxu1 %v572_v0 }
  0x33   :  { %503 = vmatpush3.bf16.msra.mxu0 %v502_v55 }
  0x34   :  { %485 = vmatpush3.bf16.msra.mxu1 %v484_v32  ;;  %504 = vmatprep.subr.bf16.mxu0 %v572_v0 }
  0x37   :  { %506 = vmatpush3.bf16.msra.mxu0 %v505_v58 }
  0x38   :  { %507 = vmatprep.subr.bf16.mxu0 %v572_v0 }
  0x3b   :  { %509 = vmatpush3.bf16.msra.mxu0 %v508_v61 }
  0xf1   :  { %v123_v49 = vpop.f32.mrb[0].mxu0 }
  0xf2   :  { %v124_v50 = vadd.f32 %v332_v48, %v123_v49  ;;  %v385_v51 = vpop.f32.mrb[1].mxu0 }
  0xf4   :  { %517 = vtanh.f32 %v124_v50 }
  0xfe   :  { %v518_v52 = vpop.eup %517 }
  0xff   :  { %419 = vmatmul.mubr.f32.vlgmr.msra.gmra.mrb[0].mxu1 %v518_v52 }
 0x1d2   :  { %v217_v63 = vpop.f32.mrb[0].mxu1 }
 0x1d3   :  { %v218_v1 = vadd.f32 %v334_v62, %v217_v63  ;;  %v420_v2 = vpop.f32.mrb[1].mxu1 }
 0x1d5   :  { %519 = vtanh.f32 %v218_v1 }
 0x1df   :  { %v520_v3 = vpop.eup %519 }
 0x1e0   :  { %454 = vmatmul.mubr.f32.vlgmr.msra.gmra.mrb[2].mxu0 %v520_v3 }
 0x2b3   :  { %v311_v5 = vpop.f32.mrb[2].mxu0 }
 0x2b4   :  { %v312_v0 = vadd.f32 %v335_v4, %v311_v5  ;;  %v455_v6 = vpop.f32.mrb[3].mxu0 }
 0x2b6   :  { %316 = vst.msk [vmem:[#allocation5] sm:$0xff] %vm315_vm2, %v312_v0 }
 0x2b7   :  { %554 = shalt.err (!%p551_p12)
}
 0x2b8   :  { %s555_s12 = scalar_lea.hbm %s776_s7, 128 }
 0x2b9   :  { %p556_p13 = scmp.ne.s32.totalorder %s776_s7, %s555_s12  ;;  %p559_p0 = scmp.lt.u32.totalorder %s555_s12, %s776_s7 }
 0x2bb   :  { %p561_p1 = pnand %p559_p0, %p556_p13 }
 0x2bd   :  { %564 = shalt.err (!%p561_p1)
}
 0x2be   :  { %326 = dma.vmem_to_hbm [thread:$0]  %s324_s9, 128, %s776_s7, [#allocation4]  }
 0x2bf   :  { %567 = dma.done.wait [#allocation4], 128  }
 0x2c0   :  { %568 = vsyncadd [#allocation4], 4294967168 }
 0x2c1   :  { %330 = vsyncpa [#allocation3], 1 }
 0x2c2   :  { %331 = vsyncpa [#allocation4], 1 }

</bundles_post_ra>
